<compile_context>
chip_gen: v7x
topology: tpu7x:2x2x1
jax: 0.10.0
libtpu: 0.0.40
codegen_flags: <defaults>
</compile_context>

<pallas_src>
import functools

import jax
import jax.numpy as jnp
from jax.experimental import pallas as pl
from jax.experimental.pallas import tpu as pltpu


def _round_up(x, m):
    return ((x + m - 1) // m) * m


def _mlcl_kernel(logits_ref, labels_ref, out_ref, *, big):
    """MultiLabelCircleLoss for one (block_n, C) tile -> lane-dense (1, block_n)."""
    x = logits_ref[...].astype(jnp.float32)
    # int8 multi-hot labels; widen before compare (cheap sign-extend unpack).
    pos = labels_ref[...].astype(jnp.int32) != 0
    neg_big = jnp.float32(-big)

    # Select-based masking: equivalent to the reference's (1-2y)*x - y*inf /
    # -(1-y)*inf for {0,1} labels, but saves ~4 VALU ops/element and avoids a
    # full-tile f32 temp for the intermediate `s`.
    s_neg = jnp.where(pos, neg_big, x)    # negatives keep +x, positives masked
    s_pos = jnp.where(pos, -x, neg_big)   # positives keep -x, negatives masked

    # logsumexp over classes with an implicit appended 0 column; both branches
    # share one max pass and one exp-sum pass over the tile.
    m_neg = jnp.maximum(jnp.max(s_neg, axis=-1, keepdims=True), 0.0)
    m_pos = jnp.maximum(jnp.max(s_pos, axis=-1, keepdims=True), 0.0)
    t_neg = jnp.sum(jnp.exp(s_neg - m_neg), axis=-1, keepdims=True) + jnp.exp(-m_neg)
    t_pos = jnp.sum(jnp.exp(s_pos - m_pos), axis=-1, keepdims=True) + jnp.exp(-m_pos)

    loss = m_neg + jnp.log(t_neg) + m_pos + jnp.log(t_pos)   # (block_n, 1)
    # Lane-dense store: one unmasked row store instead of block_n masked stores.
    out_ref[0, :] = loss[:, 0]


def _choose_tiling(n, c, logit_bytes, label_bytes):
    """Pick (block_n, num_blocks, vmem_limit_bytes) for this chip generation."""
    try:
        vmem_phys = int(pltpu.get_tpu_info().vmem_capacity_bytes)
    except Exception:  # pragma: no cover - conservative default (v7x per-core VMEM)
        vmem_phys = 64 * 1024 * 1024
    headroom = 8 * 1024 * 1024  # leave Mosaic internal-scratch headroom

    if n <= 128:
        # Single full-array block (block shape == array shape is always legal).
        need = 2 * n * c * (logit_bytes + label_bytes) + 4 * n * c * 4 + (2 << 20)
        return n, 1, int(min(max(need, 32 << 20), vmem_phys - headroom))

    # VMEM per batch row at one grid step:
    #   2 pipeline buffers per input + ~4x f32 elementwise/reduction temps.
    per_row = 2 * c * (logit_bytes + label_bytes) + 4 * c * 4 + 32
    budget = min((vmem_phys - headroom) * 3 // 4, 96 * 1024 * 1024)
    block_n = (budget // per_row // 128) * 128
    block_n = max(128, min(block_n, 4096))
    # Keep >=2 grid blocks so the "parallel" grid axis can be split across both
    # TensorCores on dual-TC chips (v7x); no-op on single-TC v5e/v6e.
    block_n = min(block_n, _round_up(pl.cdiv(n, 2), 128))

    need = block_n * per_row + (2 << 20)
    vmem_limit = int(min(max(need, 32 << 20), vmem_phys - headroom))
    return block_n, pl.cdiv(n, block_n), vmem_limit


def multilabel_circle_loss(logits, labels, reduction="mean", inf=1e12):
    """logits: (N, C) float (f32/bf16); labels: (N, C) multi-hot. Scalar loss."""
    n, c = logits.shape
    assert labels.shape == (n, c)

    # Labels travel as int8: ~4x less HBM read traffic than f32 labels.
    labels_i8 = (labels != 0).astype(jnp.int8)

    logit_bytes = jnp.dtype(logits.dtype).itemsize
    block_n, num_blocks, vmem_limit = _choose_tiling(n, c, logit_bytes, 1)

    # TODO(synk): for C < 128 a transposed (C, block_n) layout (batch -> lanes)
    # would recover full lane utilization; for very large C, tile the class dim
    # with an online logsumexp accumulator instead of a full-C block.
    kernel = functools.partial(_mlcl_kernel, big=float(inf))
    out = pl.pallas_call(
        kernel,
        out_shape=jax.ShapeDtypeStruct((1, num_blocks * block_n), jnp.float32),
        grid=(num_blocks,),
        in_specs=[
            pl.BlockSpec((block_n, c), lambda i: (i, 0)),
            pl.BlockSpec((block_n, c), lambda i: (i, 0)),
        ],
        out_specs=pl.BlockSpec((1, block_n), lambda i: (0, i)),
        compiler_params=pltpu.CompilerParams(
            dimension_semantics=("parallel",),   # independent batch tiles
            vmem_limit_bytes=vmem_limit,
        ),
    )(logits, labels_i8)

    # Ragged-tail columns (>= n) hold garbage from the padded last block; they
    # must be sliced off before any reduction.
    per_row = out[0, :n]
    if reduction == "mean":
        return jnp.mean(per_row)
    # The reference module sums for anything other than 'mean'.
    return jnp.sum(per_row)


def _reference(logits, labels, inf=1e12, reduction="mean"):
    """Pure-JAX reference, mirrors the PyTorch forward literally."""
    s = (1.0 - 2.0 * labels) * logits
    s_neg = s - labels * inf
    s_pos = s - (1.0 - labels) * inf
    zeros = jnp.zeros_like(logits[..., :1])
    s_neg = jnp.concatenate([s_neg, zeros], axis=-1)
    s_pos = jnp.concatenate([s_pos, zeros], axis=-1)
    loss = jax.nn.logsumexp(s_neg, axis=-1) + jax.nn.logsumexp(s_pos, axis=-1)
    return loss.mean() if reduction == "mean" else loss.sum()


if __name__ == "__main__":
    key = jax.random.PRNGKey(0)

    # Case 1: small single-block path (batch=16, classes=8), f32 logits, 'mean'.
    batch, num_labels = 16, 8
    k1, k2, k3 = jax.random.split(key, 3)
    logits = jax.random.normal(k1, (batch, num_labels), dtype=jnp.float32)
    labels = (jax.random.uniform(k2, (batch, num_labels)) > 0.5).astype(jnp.float32)
    loss = multilabel_circle_loss(logits, labels, reduction="mean")
    jax.block_until_ready(loss)
    ref = _reference(logits, labels, reduction="mean")
    assert jnp.allclose(loss, ref, rtol=1e-5, atol=1e-5), (loss, ref)

    # Case 2: multi-block grid with ragged tail (batch=200, classes=32),
    # bf16 logits, 'sum' reduction.
    n2, c2 = 200, 32
    k4, k5 = jax.random.split(k3)
    logits2 = jax.random.normal(k4, (n2, c2), dtype=jnp.float32).astype(jnp.bfloat16)
    labels2 = (jax.random.uniform(k5, (n2, c2)) > 0.7).astype(jnp.float32)
    loss2 = multilabel_circle_loss(logits2, labels2, reduction="sum")
    jax.block_until_ready(loss2)
    ref2 = _reference(logits2.astype(jnp.float32), labels2, reduction="sum")
    assert jnp.allclose(loss2, ref2, rtol=1e-4, atol=1e-3), (loss2, ref2)

    print("KERNEL_OK")
</pallas_src>

<mosaic_0001>
module attributes {stable_mosaic.version = 11 : i64} {
  func.func @_mlcl_kernel(%arg0: i32, %arg1: memref<16x8xf32, #tpu.memory_space<vmem>>, %arg2: memref<16x8xi8, #tpu.memory_space<vmem>>, %arg3: memref<1x16xf32, #tpu.memory_space<vmem>>) attributes {dimension_semantics = [#tpu.dimension_semantics<parallel>], iteration_bounds = array<i64: 1>, scalar_prefetch = 0 : i64, scratch_operands = 0 : i64, tpu.core_type = #tpu.core_type<tc>, window_params = [{transform_indices = @transform_0, window_bounds = array<i64: 16, 8>}, {transform_indices = @transform_1, window_bounds = array<i64: 16, 8>}, {transform_indices = @transform_2, window_bounds = array<i64: 1, 16>}]} {
    %c0 = arith.constant 0 : index
    %c0_0 = arith.constant 0 : index
    %0 = vector.load %arg1[%c0, %c0_0] : memref<16x8xf32, #tpu.memory_space<vmem>>, vector<16x8xf32>
    %c0_1 = arith.constant 0 : index
    %c0_2 = arith.constant 0 : index
    %1 = vector.load %arg2[%c0_1, %c0_2] : memref<16x8xi8, #tpu.memory_space<vmem>>, vector<16x8xi8>
    %2 = arith.extsi %1 : vector<16x8xi8> to vector<16x8xi32>
    %c0_i32 = arith.constant 0 : i32
    %3 = vector.broadcast %c0_i32 : i32 to vector<16x8xi32>
    %4 = arith.cmpi ne, %2, %3 : vector<16x8xi32>
    %cst = arith.constant -9.99999995E+11 : f32
    %5 = vector.broadcast %cst : f32 to vector<16x8xf32>
    %6 = arith.select %4, %5, %0 : vector<16x8xi1>, vector<16x8xf32>
    %cst_3 = arith.constant 0.000000e+00 : f32
    %7 = vector.broadcast %cst_3 : f32 to vector<16x8xf32>
    %8 = arith.subf %7, %0 : vector<16x8xf32>
    %cst_4 = arith.constant -9.99999995E+11 : f32
    %9 = vector.broadcast %cst_4 : f32 to vector<16x8xf32>
    %10 = arith.select %4, %8, %9 : vector<16x8xi1>, vector<16x8xf32>
    %cst_5 = arith.constant dense<0xFF800000> : vector<16xf32>
    %11 = vector.multi_reduction <maximumf>, %6, %cst_5 [1] : vector<16x8xf32> to vector<16xf32>
    %12 = vector.shape_cast %11 : vector<16xf32> to vector<16x1xf32>
    %cst_6 = arith.constant 0.000000e+00 : f32
    %13 = vector.broadcast %cst_6 : f32 to vector<16x1xf32>
    %14 = arith.maximumf %12, %13 : vector<16x1xf32>
    %cst_7 = arith.constant dense<0xFF800000> : vector<16xf32>
    %15 = vector.multi_reduction <maximumf>, %10, %cst_7 [1] : vector<16x8xf32> to vector<16xf32>
    %16 = vector.shape_cast %15 : vector<16xf32> to vector<16x1xf32>
    %cst_8 = arith.constant 0.000000e+00 : f32
    %17 = vector.broadcast %cst_8 : f32 to vector<16x1xf32>
    %18 = arith.maximumf %16, %17 : vector<16x1xf32>
    %19 = vector.broadcast %14 : vector<16x1xf32> to vector<16x8xf32>
    %20 = arith.subf %6, %19 : vector<16x8xf32>
    %21 = math.exp %20 : vector<16x8xf32>
    %cst_9 = arith.constant dense<0.000000e+00> : vector<16xf32>
    %22 = vector.multi_reduction <add>, %21, %cst_9 [1] : vector<16x8xf32> to vector<16xf32>
    %23 = vector.shape_cast %22 : vector<16xf32> to vector<16x1xf32>
    %cst_10 = arith.constant 0.000000e+00 : f32
    %24 = vector.broadcast %cst_10 : f32 to vector<16x1xf32>
    %25 = arith.subf %24, %14 : vector<16x1xf32>
    %26 = math.exp %25 : vector<16x1xf32>
    %27 = arith.addf %23, %26 : vector<16x1xf32>
    %28 = vector.broadcast %18 : vector<16x1xf32> to vector<16x8xf32>
    %29 = arith.subf %10, %28 : vector<16x8xf32>
    %30 = math.exp %29 : vector<16x8xf32>
    %cst_11 = arith.constant dense<0.000000e+00> : vector<16xf32>
    %31 = vector.multi_reduction <add>, %30, %cst_11 [1] : vector<16x8xf32> to vector<16xf32>
    %32 = vector.shape_cast %31 : vector<16xf32> to vector<16x1xf32>
    %cst_12 = arith.constant 0.000000e+00 : f32
    %33 = vector.broadcast %cst_12 : f32 to vector<16x1xf32>
    %34 = arith.subf %33, %18 : vector<16x1xf32>
    %35 = math.exp %34 : vector<16x1xf32>
    %36 = arith.addf %32, %35 : vector<16x1xf32>
    %37 = math.log %27 : vector<16x1xf32>
    %38 = arith.addf %14, %37 : vector<16x1xf32>
    %39 = arith.addf %38, %18 : vector<16x1xf32>
    %40 = math.log %36 : vector<16x1xf32>
    %41 = arith.addf %39, %40 : vector<16x1xf32>
    %42 = vector.shape_cast %41 : vector<16x1xf32> to vector<16xf32>
    %c0_13 = arith.constant 0 : index
    %c0_14 = arith.constant 0 : index
    %43 = vector.load %arg3[%c0_13, %c0_14] : memref<1x16xf32, #tpu.memory_space<vmem>>, vector<1x16xf32>
    %44 = vector.shape_cast %43 : vector<1x16xf32> to vector<16xf32>
    %45 = vector.shape_cast %42 : vector<16xf32> to vector<1x16xf32>
    tpu.vector_store %arg3[%c0_13, %c0_14], %45 {strides = array<i32>} : memref<1x16xf32, #tpu.memory_space<vmem>>, vector<1x16xf32>,
    return
  }
  func.func @transform_0(%arg0: i32) -> (i32, i32) {
    %c0_i32 = arith.constant 0 : i32
    %c0_i32_0 = arith.constant 0 : i32
    return %arg0, %c0_i32 : i32, i32
  }
  func.func @transform_1(%arg0: i32) -> (i32, i32) {
    %c0_i32 = arith.constant 0 : i32
    %c0_i32_0 = arith.constant 0 : i32
    return %arg0, %c0_i32 : i32, i32
  }
  func.func @transform_2(%arg0: i32) -> (i32, i32) {
    %c0_i32 = arith.constant 0 : i32
    %c0_i32_0 = arith.constant 0 : i32
    return %c0_i32, %arg0 : i32, i32
  }
}

</mosaic_0001>

<bundles_post_ra>
// kernel: tpu_custom_call.1
= control target key start
LH: loop header
LB: loop body
LE: loop exit
PB: predicated region body
PF: predicated region fallthrough
CT: control target
= control target key end

     0   :  { %s237_s0 = inlined_call_operand.vmem [shape: f32[16,8], index: 0, kind: input, shape index: {}]   ;;  %s238_s1 = inlined_call_operand.vmem [shape: s8[16,8], index: 1, kind: input, shape index: {}]   ;;  %s239_s2 = inlined_call_operand.hbm [shape: f32[1,16], index: 2, kind: output, shape index: {}]  }
   0x1   :  { %v12_v0 = vld [vmem:[%s237_s0] sm:$0xff]  ;;  %v13_v2 = vld [vmem:[%s237_s0 + $0x8] sm:$0xff] }
   0x2   :  { %v130_v1 = vld [vmem:[%s238_s1] sm:$0xf]   ;;  %v22_v4 = vsub.f32 0.0, %v12_v0  ;;  %v23_v6 = vsub.f32 0.0, %v13_v2 }
   0x3   :  { %v131_v3 = vunpack.c.0.s8 %v130_v1  ;;  %v132_v5 = vunpack.c.1.s8 %v130_v1 }
   0x4   :  { %7 = vsyncpa [#allocation3], 0  ;;  %vm26_vm0 = vcmask 64512   ;;  %v99_v60 = vlaneseq  ;;  %s182_s0 = smov [#allocation2]   ;;  %vm110_vm3 = vcmask 130112   ;;  %vm113_vm4 = vcmask 122880  }
   0x5   :  { %vm18_vm1 = vcmp.ne.s32.totalorder %v131_v3, 0  ;;  %vm19_vm2 = vcmp.ne.s32.totalorder %v132_v5, 0  ;;  %s121_s1 = sshll.u32 %s182_s0, 4  ;;  %s122_s1 = int_to_ptr.vmem [resolvable:$true] %s121_s1 }
   0x6   :  { %v20_v7 = vsel %vm18_vm1, -1e+12, %v12_v0  ;;  %v24_v8 = vsel %vm18_vm1, %v22_v4, -1e+12  ;;  %v21_v9 = vsel %vm19_vm2, -1e+12, %v13_v2  ;;  %p163_p1 = scmp.lt.s32.totalorder %s122_s1, %s122_s1 }
   0x7   :  { %v27_v10 = vsel %vm26_vm0, %v20_v7, -inf  ;;  %v35_v11 = vsel %vm26_vm0, %v24_v8, -inf  ;;  %v25_v12 = vsel %vm19_vm2, %v23_v6, -1e+12  ;;  %v30_v13 = vsel %vm26_vm0, %v21_v9, -inf  ;;  %s158_s15 = scalar_lea.vmem %s122_s1, 16 }
   0x8   :  { %28 = vmax.xlane.f32.xlu0 %v27_v10  ;;  %36 = vmax.xlane.f32.xlu1 %v35_v11  ;;  %v38_v14 = vsel %vm26_vm0, %v25_v12, -inf  ;;  %v100_v0 = vand.u32 127, %v99_v60  ;;  %v102_v2 = vshrl.u32 %v99_v60, 7  ;;  %p159_p0 = scmp.ne.s32.totalorder %s122_s1, %s158_s15  ;;  %s162_s16 = scalar_lea.vmem %s122_s1, 32 }
   0x9   :  { %p164_p2 = scmp.lt.s32.totalorder %s162_s16, %s158_s15 }
   0xa   :  { %v105_v6 = vadd.s32 4294967288, %v100_v0 }
   0xb   :  { %p165_p3 = por %p164_p2, %p163_p1 }
   0xc   :  { %31 = vmax.xlane.f32.xlu0 %v30_v13  ;;  %39 = vmax.xlane.f32.xlu1 %v38_v14  ;;  %v108_v13 = vsub.s32 %v105_v6, %v102_v2 }
   0xd   :  { %p166_p4 = pnand %p165_p3, %p159_p0 }
  0x95   :  { %v29_v15 = vpop.xlane.xlu0 %28  ;;  %v37_v16 = vpop.xlane.xlu1 %36 }
  0x96   :  { %v33_v17 = vmax.f32 %v29_v15, 0.0  ;;  %v211_v18 = vmax.f32 %v37_v16, 0.0 }
  0x98   :  { %v43_v19 = vsub.f32 %v20_v7, %v33_v17  ;;  %v63_v20 = vsub.f32 %v24_v8, %v211_v18  ;;  %v55_v39 = vsub.f32 0.0, %v33_v17  ;;  %v75_v41 = vsub.f32 0.0, %v211_v18 }
  0x99   :  { %v32_v21 = vpop.xlane.xlu0 %31  ;;  %v40_v22 = vpop.xlane.xlu1 %39 }
  0x9a   :  { %v45_v23 = vmul.f32 1.442695, %v43_v19  ;;  %v65_v24 = vmul.f32 1.442695, %v63_v20  ;;  %v34_v25 = vmax.f32 %v32_v21, 0.0  ;;  %v214_v26 = vmax.f32 %v40_v22, 0.0 }
  0x9b   :  { %v57_v40 = vmul.f32 1.442695, %v55_v39  ;;  %v77_v43 = vmul.f32 1.442695, %v75_v41 }
  0x9c   :  { %134 = vpow2.f32 %v45_v23  ;;  %v44_v27 = vsub.f32 %v21_v9, %v34_v25  ;;  %v64_v28 = vsub.f32 %v25_v12, %v214_v26  ;;  %v56_v42 = vsub.f32 0.0, %v34_v25 }
  0x9d   :  { %136 = vpow2.f32 %v65_v24  ;;  %v76_v45 = vsub.f32 0.0, %v214_v26  ;;  %v103_v9 = vsub.s32 %v100_v0, %v102_v2 }
  0x9e   :  { %v47_v29 = vmul.f32 1.442695, %v44_v27  ;;  %v67_v30 = vmul.f32 1.442695, %v64_v28  ;;  %v59_v44 = vmul.f32 1.442695, %v56_v42 }
  0x9f   :  { %v79_v46 = vmul.f32 1.442695, %v76_v45 }
  0xa0   :  { %138 = vpow2.f32 %v47_v29 }
  0xa1   :  { %140 = vpow2.f32 %v67_v30 }
  0xa2   :  { %142 = vpow2.f32 %v57_v40 }
  0xa3   :  { %144 = vpow2.f32 %v77_v43 }
  0xa4   :  { %146 = vpow2.f32 %v59_v44 }
  0xa5   :  { %148 = vpow2.f32 %v79_v46 }
  0xa6   :  { %v135_v31 = vpop.eup %134 }
  0xa7   :  { %v49_v32 = vsel %vm26_vm0, %v135_v31, 0.0  ;;  %v137_v33 = vpop.eup %136 }
  0xa8   :  { %50 = vadd.xlane.f32.xlu0 %v49_v32  ;;  %v69_v34 = vsel %vm26_vm0, %v137_v33, 0.0 }
  0xaa   :  { %v139_v35 = vpop.eup %138 }
  0xab   :  { %v52_v36 = vsel %vm26_vm0, %v139_v35, 0.0  ;;  %v141_v37 = vpop.eup %140 }
  0xac   :  { %70 = vadd.xlane.f32.xlu0 %v69_v34  ;;  %53 = vadd.xlane.f32.xlu1 %v52_v36  ;;  %v72_v38 = vsel %vm26_vm0, %v141_v37, 0.0  ;;  %v143_v47 = vpop.eup %142 }
  0xad   :  { %v145_v50 = vpop.eup %144 }
  0xae   :  { %v147_v52 = vpop.eup %146 }
  0xaf   :  { %v149_v56 = vpop.eup %148 }
  0xb0   :  { %73 = vadd.xlane.f32.xlu1 %v72_v38 }
 0x135   :  { %v51_v48 = vpop.xlane.xlu0 %50 }
 0x136   :  { %v61_v49 = vadd.f32 %v143_v47, %v51_v48 }
 0x138   :  { %150 = vlog2.f32 %v61_v49 }
 0x139   :  { %v71_v51 = vpop.xlane.xlu0 %70  ;;  %v54_v53 = vpop.xlane.xlu1 %53 }
 0x13a   :  { %v81_v54 = vadd.f32 %v145_v50, %v71_v51  ;;  %v62_v55 = vadd.f32 %v147_v52, %v54_v53 }
 0x13c   :  { %152 = vlog2.f32 %v81_v54 }
 0x13d   :  { %154 = vlog2.f32 %v62_v55  ;;  %v74_v57 = vpop.xlane.xlu1 %73 }
 0x13e   :  { %v82_v58 = vadd.f32 %v149_v56, %v74_v57 }
 0x140   :  { %156 = vlog2.f32 %v82_v58 }
 0x142   :  { %v151_v59 = vpop.eup %150 }
 0x143   :  { %v84_v61 = vmul.f32 0.6931472, %v151_v59 }
 0x145   :  { %v87_v62 = vadd.f32 %v84_v61, %v33_v17 }
 0x146   :  { %v153_v63 = vpop.eup %152 }
 0x147   :  { %v155_v1 = vpop.eup %154  ;;  %v89_v4 = vadd.f32 %v87_v62, %v211_v18  ;;  %v92_v5 = vmul.f32 0.6931472, %v153_v63 }
 0x148   :  { %v86_v3 = vmul.f32 0.6931472, %v155_v1 }
 0x149   :  { %v95_v10 = vadd.f32 %v92_v5, %v89_v4 }
 0x14a   :  { %v88_v7 = vadd.f32 %v86_v3, %v34_v25  ;;  %v157_v8 = vpop.eup %156 }
 0x14b   :  { %v94_v12 = vmul.f32 0.6931472, %v157_v8  ;;  %v104_v15 = vrot.slane %v95_v10, %v103_v9 }
 0x14c   :  { %v90_v11 = vadd.f32 %v88_v7, %v214_v26 }
 0x14e   :  { %v96_v14 = vadd.f32 %v94_v12, %v90_v11 }
 0x150   :  { %v109_v16 = vrot.slane %v96_v14, %v108_v13 }
 0x152   :  { %v111_v17 = vsel %vm110_vm3, %v109_v16, %v104_v15 }
 0x153   :  { %114 = vst.msk [vmem:[#allocation2] sm:$0x1] %vm113_vm4, %v111_v17 }
 0x154   :  { %169 = shalt.err (!%p166_p4)
}
 0x155   :  { %s170_s19 = scalar_lea.hbm %s239_s2, 16 }
 0x156   :  { %p171_p5 = scmp.ne.s32.totalorder %s239_s2, %s170_s19  ;;  %p174_p6 = scmp.lt.u32.totalorder %s170_s19, %s239_s2 }
 0x158   :  { %p176_p7 = pnand %p174_p6, %p171_p5 }
 0x15a   :  { %179 = shalt.err (!%p176_p7)
}
 0x15b   :  { %124 = dma.vmem_to_hbm [thread:$0]  %s122_s1, 16, %s239_s2, [#allocation3]  }
 0x15c   :  { %180 = dma.done.wait [#allocation3], 16  }
 0x15d   :  { %181 = vsyncadd [#allocation3], 4294967280 }
 0x15e   :  { %128 = vsyncpa [#allocation3], 1 }

</bundles_post_ra>
